<compile_context>
chip_gen: v5e
topology: v5e:2x2
jax: 0.10.0
libtpu: 0.0.40
codegen_flags: <defaults>
</compile_context>

<pallas_src>
import functools

import jax
import jax.numpy as jnp
from jax import lax
from jax.experimental import pallas as pl
from jax.experimental.pallas import tpu as pltpu

_LANES = 128
_SUBLANES = 8
_FAST_PATH_ELEMS = 1 << 17   # below ~64k pairs a fused jnp expression wins


def _round_up(x: int, m: int) -> int:
    return ((x + m - 1) // m) * m


def _rosenbrock_kernel(scale_ref, m_ref, out_ref, acc1_ref, acc2_ref, *,
                       total_elems, block_rows):
    # scale_ref: SMEM (2,)  f32  -> [a, b]
    # m_ref:     VMEM (br, 128) f32 -> flat params, pairs interleaved in lanes
    # out_ref:   SMEM (1,)  f32  -> final scalar result
    # acc1/acc2: VMEM (1, 128) f32 -> lane accumulators for (m1-a)^2, (m1^2-m0)^2
    c = pl.program_id(0)

    @pl.when(c == 0)
    def _init():
        acc1_ref[...] = jnp.zeros_like(acc1_ref)
        acc2_ref[...] = jnp.zeros_like(acc2_ref)

    a = scale_ref[0]
    x = m_ref[...]                                   # (br, 128)

    # Flat layout is [m0_0, m1_0, m0_1, m1_1, ...]: odd lanes hold m1, their
    # m0 partner sits one lane to the left.  roll(x, 1) brings lane i-1 to
    # lane i (XLU rotate), so at odd lanes: m1 = x, m0 = rolled.
    rolled = pltpu.roll(x, shift=1, axis=1)
    m1 = x
    m0 = rolled

    lane = lax.broadcasted_iota(jnp.int32, x.shape, 1)
    row = lax.broadcasted_iota(jnp.int32, x.shape, 0)
    gidx = (c * block_rows + row) * _LANES + lane    # global flat element idx
    valid = jnp.logical_and((lane & 1) == 1, gidx < total_elems)

    d1 = m1 - a
    d2 = m1 * m1 - m0
    t1 = jnp.where(valid, d1 * d1, 0.0)
    t2 = jnp.where(valid, d2 * d2, 0.0)

    # Fold the block contribution into (1, 128) lane accumulators (per-step
    # sublane reduce is free filler under the HBM roofline).
    acc1_ref[...] += jnp.sum(t1, axis=0, keepdims=True)
    acc2_ref[...] += jnp.sum(t2, axis=0, keepdims=True)

    @pl.when(c == pl.num_programs(0) - 1)
    def _finalize():
        b = scale_ref[1]
        out_ref[0] = jnp.sum(acc1_ref[...]) + b * jnp.sum(acc2_ref[...])


def rosenbrock_t_forward(params, a, b, x=None, *, max_block_rows=4096,
                         force_kernel=False):
    """params: (d, 2) float32, column 0 = m[0], column 1 = m[1].

    `x` is accepted for API parity with the PyTorch module but is unused
    (the reference forward never touches its input)."""
    del x  # unused by the module's forward
    params = jnp.asarray(params, jnp.float32)
    d = params.shape[0]
    total = 2 * d

    # Fast path: for small d the pallas_call dispatch dominates wall time.
    if total <= _FAST_PATH_ELEMS and not force_kernel:
        m0 = params[:, 0]
        m1 = params[:, 1]
        return jnp.sum((m1 - a) ** 2 + b * (m1 * m1 - m0) ** 2)

    # Free row-major flatten; pad only up to the next (8*128)-element boundary
    # so the lane-dense reshape is legal (pad values are masked in-kernel).
    flat = params.reshape(-1)
    padded_total = _round_up(total, _SUBLANES * _LANES)
    if padded_total != total:
        flat = jnp.pad(flat, (0, padded_total - total))
    rows = padded_total // _LANES
    slab = flat.reshape(rows, _LANES)

    br = min(_round_up(max_block_rows, _SUBLANES), rows)   # rows is a mult of 8
    n_chunks = pl.cdiv(rows, br)

    # Runtime SMEM scalars: no recompile per (a, b), works with traced values.
    scales = jnp.stack([jnp.asarray(a, jnp.float32), jnp.asarray(b, jnp.float32)])

    kernel = functools.partial(_rosenbrock_kernel,
                               total_elems=total, block_rows=br)

    out = pl.pallas_call(
        kernel,
        out_shape=jax.ShapeDtypeStruct((1,), jnp.float32),
        grid=(n_chunks,),
        in_specs=[
            pl.BlockSpec(memory_space=pltpu.MemorySpace.SMEM),       # [a, b]
            pl.BlockSpec((br, _LANES), lambda c: (c, 0)),            # slab
        ],
        out_specs=pl.BlockSpec(memory_space=pltpu.MemorySpace.SMEM),
        scratch_shapes=[pltpu.VMEM((1, _LANES), jnp.float32),
                        pltpu.VMEM((1, _LANES), jnp.float32)],
        compiler_params=pltpu.CompilerParams(
            dimension_semantics=("arbitrary",)),
    )(scales, slab)

    return out[0]


def _reference(params, a, b):
    m0 = params[:, 0].astype(jnp.float32)
    m1 = params[:, 1].astype(jnp.float32)
    return jnp.sum((m1 - a) ** 2 + b * (m1 ** 2 - m0) ** 2)


if __name__ == "__main__":
    a, b = 1.0, 100.0
    key = jax.random.PRNGKey(0)
    kp, kp2, kx = jax.random.split(key, 3)

    # --- primary check: module-sized case (d = 8), kernel path -------------
    d = 8
    params = jax.random.normal(kp, (d, 2), dtype=jnp.float32)
    x = jax.random.normal(kx, (2, d), dtype=jnp.float32)   # ignored by forward

    result = rosenbrock_t_forward(params, a, b, x, force_kernel=True)
    result = jax.block_until_ready(result)
    ref = _reference(params, a, b)
    assert jnp.allclose(result, ref, rtol=1e-5, atol=1e-4), (result, ref)

    # --- fast path (default for small d) ------------------------------------
    result_fast = jax.block_until_ready(rosenbrock_t_forward(params, a, b, x))
    assert jnp.allclose(result_fast, ref, rtol=1e-5, atol=1e-4), (result_fast, ref)

    # --- secondary check: multi-chunk grid + ragged-tail / partial-block mask
    d2 = 2500
    params2 = jax.random.normal(kp2, (d2, 2), dtype=jnp.float32)
    result2 = rosenbrock_t_forward(params2, a, b,
                                   force_kernel=True, max_block_rows=16)
    result2 = jax.block_until_ready(result2)
    ref2 = _reference(params2, a, b)
    assert jnp.allclose(result2, ref2, rtol=1e-4, atol=1e-3), (result2, ref2)

    print("KERNEL_OK")
</pallas_src>

<mosaic_0001>
module attributes {stable_mosaic.version = 11 : i64} {
  func.func @_rosenbrock_kernel(%arg0: i32, %arg1: memref<2xf32, #tpu.memory_space<smem>>, %arg2: memref<8x128xf32, #tpu.memory_space<vmem>>, %arg3: memref<1xf32, #tpu.memory_space<smem>>, %arg4: memref<1x128xf32, #tpu.memory_space<vmem>>, %arg5: memref<1x128xf32, #tpu.memory_space<vmem>>) attributes {dimension_semantics = [#tpu.dimension_semantics<arbitrary>], iteration_bounds = array<i64: 1>, scalar_prefetch = 0 : i64, scratch_operands = 2 : i64, tpu.core_type = #tpu.core_type<tc>, window_params = [{transform_indices = @transform_0, window_bounds = array<i64: 2>}, {transform_indices = @transform_1, window_bounds = array<i64: 8, 128>}, {transform_indices = @transform_2, window_bounds = array<i64: 1>}]} {
    %c0_i32 = arith.constant 0 : i32
    %0 = arith.cmpi eq, %arg0, %c0_i32 : i32
    %1 = arith.extui %0 : i1 to i32
    %c0_i32_0 = arith.constant 0 : i32
    %2 = arith.cmpi ne, %1, %c0_i32_0 : i32
    scf.if %2 {
      %cst_18 = arith.constant 0.000000e+00 : f32
      %44 = vector.broadcast %cst_18 : f32 to vector<1x128xf32>
      %c0_19 = arith.constant 0 : index
      %c0_20 = arith.constant 0 : index
      %45 = vector.load %arg4[%c0_19, %c0_20] : memref<1x128xf32, #tpu.memory_space<vmem>>, vector<1x128xf32>
      tpu.vector_store %arg4[%c0_19, %c0_20], %44 {strides = array<i32>} : memref<1x128xf32, #tpu.memory_space<vmem>>, vector<1x128xf32>,
      %cst_21 = arith.constant 0.000000e+00 : f32
      %46 = vector.broadcast %cst_21 : f32 to vector<1x128xf32>
      %c0_22 = arith.constant 0 : index
      %c0_23 = arith.constant 0 : index
      %47 = vector.load %arg5[%c0_22, %c0_23] : memref<1x128xf32, #tpu.memory_space<vmem>>, vector<1x128xf32>
      tpu.vector_store %arg5[%c0_22, %c0_23], %46 {strides = array<i32>} : memref<1x128xf32, #tpu.memory_space<vmem>>, vector<1x128xf32>,
    } else {
    }
    %c0 = arith.constant 0 : index
    %3 = memref.load %arg1[%c0] : memref<2xf32, #tpu.memory_space<smem>>
    %c0_1 = arith.constant 0 : index
    %c0_2 = arith.constant 0 : index
    %4 = vector.load %arg2[%c0_1, %c0_2] : memref<8x128xf32, #tpu.memory_space<vmem>>, vector<8x128xf32>
    %c1_i32 = arith.constant 1 : i32
    %5 = tpu.dynamic_rotate %4 by %c1_i32 dim 1 : vector<8x128xf32>, i32 -> vector<8x128xf32>
    %6 = tpu.iota {dimensions = array<i32: 1>} : vector<8x128xi32>
    %7 = tpu.iota {dimensions = array<i32: 0>} : vector<8x128xi32>
    %c8_i32 = arith.constant 8 : i32
    %8 = arith.muli %arg0, %c8_i32 : i32
    %9 = vector.broadcast %8 : i32 to vector<8x128xi32>
    %10 = arith.addi %9, %7 : vector<8x128xi32>
    %c128_i32 = arith.constant 128 : i32
    %11 = vector.broadcast %c128_i32 : i32 to vector<8x128xi32>
    %12 = arith.muli %10, %11 : vector<8x128xi32>
    %13 = arith.addi %12, %6 : vector<8x128xi32>
    %c1_i32_3 = arith.constant 1 : i32
    %14 = vector.broadcast %c1_i32_3 : i32 to vector<8x128xi32>
    %15 = arith.andi %6, %14 : vector<8x128xi32>
    %c1_i32_4 = arith.constant 1 : i32
    %16 = vector.broadcast %c1_i32_4 : i32 to vector<8x128xi32>
    %17 = arith.cmpi eq, %15, %16 : vector<8x128xi32>
    %c16_i32 = arith.constant 16 : i32
    %18 = vector.broadcast %c16_i32 : i32 to vector<8x128xi32>
    %19 = arith.cmpi slt, %13, %18 : vector<8x128xi32>
    %20 = arith.andi %17, %19 : vector<8x128xi1>
    %21 = vector.broadcast %3 : f32 to vector<8x128xf32>
    %22 = arith.subf %4, %21 : vector<8x128xf32>
    %23 = arith.mulf %4, %4 : vector<8x128xf32>
    %24 = arith.subf %23, %5 : vector<8x128xf32>
    %25 = arith.mulf %22, %22 : vector<8x128xf32>
    %cst = arith.constant 0.000000e+00 : f32
    %26 = vector.broadcast %cst : f32 to vector<8x128xf32>
    %27 = arith.select %20, %25, %26 : vector<8x128xi1>, vector<8x128xf32>
    %28 = arith.mulf %24, %24 : vector<8x128xf32>
    %cst_5 = arith.constant 0.000000e+00 : f32
    %29 = vector.broadcast %cst_5 : f32 to vector<8x128xf32>
    %30 = arith.select %20, %28, %29 : vector<8x128xi1>, vector<8x128xf32>
    %c0_6 = arith.constant 0 : index
    %c0_7 = arith.constant 0 : index
    %31 = vector.load %arg4[%c0_6, %c0_7] : memref<1x128xf32, #tpu.memory_space<vmem>>, vector<1x128xf32>
    %cst_8 = arith.constant dense<0.000000e+00> : vector<128xf32>
    %32 = vector.multi_reduction <add>, %27, %cst_8 [0] : vector<8x128xf32> to vector<128xf32>
    %33 = vector.shape_cast %32 : vector<128xf32> to vector<1x128xf32>
    %34 = arith.addf %31, %33 : vector<1x128xf32>
    %c0_9 = arith.constant 0 : index
    %c0_10 = arith.constant 0 : index
    %35 = vector.load %arg4[%c0_9, %c0_10] : memref<1x128xf32, #tpu.memory_space<vmem>>, vector<1x128xf32>
    tpu.vector_store %arg4[%c0_9, %c0_10], %34 {strides = array<i32>} : memref<1x128xf32, #tpu.memory_space<vmem>>, vector<1x128xf32>,
    %c0_11 = arith.constant 0 : index
    %c0_12 = arith.constant 0 : index
    %36 = vector.load %arg5[%c0_11, %c0_12] : memref<1x128xf32, #tpu.memory_space<vmem>>, vector<1x128xf32>
    %cst_13 = arith.constant dense<0.000000e+00> : vector<128xf32>
    %37 = vector.multi_reduction <add>, %30, %cst_13 [0] : vector<8x128xf32> to vector<128xf32>
    %38 = vector.shape_cast %37 : vector<128xf32> to vector<1x128xf32>
    %39 = arith.addf %36, %38 : vector<1x128xf32>
    %c0_14 = arith.constant 0 : index
    %c0_15 = arith.constant 0 : index
    %40 = vector.load %arg5[%c0_14, %c0_15] : memref<1x128xf32, #tpu.memory_space<vmem>>, vector<1x128xf32>
    tpu.vector_store %arg5[%c0_14, %c0_15], %39 {strides = array<i32>} : memref<1x128xf32, #tpu.memory_space<vmem>>, vector<1x128xf32>,
    %c0_i32_16 = arith.constant 0 : i32
    %41 = arith.cmpi eq, %arg0, %c0_i32_16 : i32
    %42 = arith.extui %41 : i1 to i32
    %c0_i32_17 = arith.constant 0 : i32
    %43 = arith.cmpi ne, %42, %c0_i32_17 : i32
    scf.if %43 {
      %c1 = arith.constant 1 : index
      %44 = memref.load %arg1[%c1] : memref<2xf32, #tpu.memory_space<smem>>
      %c0_18 = arith.constant 0 : index
      %c0_19 = arith.constant 0 : index
      %45 = vector.load %arg4[%c0_18, %c0_19] : memref<1x128xf32, #tpu.memory_space<vmem>>, vector<1x128xf32>
      %46 = vector.shape_cast %45 : vector<1x128xf32> to vector<1x1x128xf32>
      %cst_20 = arith.constant dense<0.000000e+00> : vector<1xf32>
      %47 = vector.multi_reduction <add>, %46, %cst_20 [1, 2] : vector<1x1x128xf32> to vector<1xf32>
      %48 = vector.shape_cast %47 : vector<1xf32> to vector<1x1x1xf32>
      %49 = vector.extract %48[0, 0, 0] : f32 from vector<1x1x1xf32>
      %c0_21 = arith.constant 0 : index
      %c0_22 = arith.constant 0 : index
      %50 = vector.load %arg5[%c0_21, %c0_22] : memref<1x128xf32, #tpu.memory_space<vmem>>, vector<1x128xf32>
      %51 = vector.shape_cast %50 : vector<1x128xf32> to vector<1x1x128xf32>
      %cst_23 = arith.constant dense<0.000000e+00> : vector<1xf32>
      %52 = vector.multi_reduction <add>, %51, %cst_23 [1, 2] : vector<1x1x128xf32> to vector<1xf32>
      %53 = vector.shape_cast %52 : vector<1xf32> to vector<1x1x1xf32>
      %54 = vector.extract %53[0, 0, 0] : f32 from vector<1x1x1xf32>
      %55 = arith.mulf %44, %54 : f32
      %56 = arith.addf %49, %55 : f32
      %c0_24 = arith.constant 0 : index
      %57 = memref.load %arg3[%c0_24] : memref<1xf32, #tpu.memory_space<smem>>
      memref.store %56, %arg3[%c0_24] : memref<1xf32, #tpu.memory_space<smem>>
    } else {
    }
    return
  }
  func.func @transform_0(%arg0: i32) -> i32 {
    %c0_i32 = arith.constant 0 : i32
    %c0_i32_0 = arith.constant 0 : i32
    return %c0_i32 : i32
  }
  func.func @transform_1(%arg0: i32) -> (i32, i32) {
    %c0_i32 = arith.constant 0 : i32
    %c0_i32_0 = arith.constant 0 : i32
    return %arg0, %c0_i32 : i32, i32
  }
  func.func @transform_2(%arg0: i32) -> i32 {
    %c0_i32 = arith.constant 0 : i32
    %c0_i32_0 = arith.constant 0 : i32
    return %c0_i32 : i32
  }
}

</mosaic_0001>

<bundles_post_ra>
// kernel: tpu_custom_call.1
= control target key start
LH: loop header
LB: loop body
LE: loop exit
PB: predicated region body
PF: predicated region fallthrough
CT: control target
= control target key end

     0   :  { %7 = vsyncpa [#allocation6], 0  ;;  %s239_s0 = inlined_call_operand.hbm [shape: f32[2], index: 0, kind: input, shape index: {}]   ;;  %s240_s1 = inlined_call_operand.hbm [shape: f32[8,128], index: 1, kind: input, shape index: {}]   ;;  %s241_s2 = inlined_call_operand.hbm [shape: f32[1], index: 2, kind: output, shape index: {}]  }
   0x1   :  { %8 = vsyncpa [#allocation5], 0 }
   0x2   :  { %9 = vsyncpa [#allocation7], 0  ;;  %s15_s11 = sshll.u32 %s239_s0, 4  ;;  %s24_s14 = sshll.u32 %s240_s1, 4  ;;  %s16_s11 = int_to_ptr.hbm [resolvable:$true] %s15_s11  ;;  %s25_s14 = int_to_ptr.hbm [resolvable:$true] %s24_s14 }
   0x3   :  { %s200_s15 = smov [#allocation4]   ;;  %s201_s16 = smov [#allocation8]  }
   0x4   :  { %18 = dma.hbm_to_smem %s16_s11, 16, %s200_s15, [#allocation6]  }
   0x5   :  { %s26_s17 = sshll.u32 %s201_s16, 4  ;;  %s27_s17 = int_to_ptr.vmem [resolvable:$true] %s26_s17 }
   0x6   :  { %29 = dma.hbm_to_vmem [thread:$0]  %s25_s14, 128, %s27_s17, [#allocation5]  }
   0x7   :  { %194 = dma.done.wait [#allocation6], 16  }
   0x8   :  { %195 = vsyncadd [#allocation6], 4294967280 }
   0x9   :  { %196 = dma.done.wait [#allocation5], 128  }
   0xa   :  { %197 = vsyncadd [#allocation5], 4294967168 }
   0xb   :  { %38 = sfence }
   0xc   :  { %v46_v0 = vld [vmem:[#allocation8] sm:$0xff]  ;;  %s202_s18 = smov 1   ;;  %v49_v1 = vlaneseq  ;;  %s45_s0 = sld [smem:[#allocation4]]  ;;  %v203_v13 = vmov 0.0   ;;  %vm93_vm3 = vcmask 1040384  }
   0xd   :  { %47 = vrot.lane.b32.xlu0 %v46_v0, %s202_s18  ;;  %43 = vst [vmem:[#allocation2] sm:$0x1] %v203_v13  ;;  %v64_v23 = vmul.f32 %v46_v0, %v46_v0  ;;  %s136_s1 = sld [smem:[#allocation4 + $0x1]]  ;;  %s124_s22 = sshll.u32 %s241_s2, 4  ;;  %s125_s22 = int_to_ptr.hbm [resolvable:$true] %s124_s22 }
   0xe   :  { %v52_v2 = vshrl.u32 %v49_v1, 7  ;;  %v50_v3 = vand.u32 127, %v49_v1  ;;  %44 = vst [vmem:[#allocation3] sm:$0x1] %v203_v13  ;;  %s204_s26 = smov [#allocation9]  }
  0x10   :  { %v56_v4 = vmul.u32 128, %v52_v2  ;;  %v58_v7 = vand.u32 1, %v50_v3 }
  0x12   :  { %v62_v5 = vstv %s45_s0  ;;  %v57_v6 = vadd.s32 %v56_v4, %v50_v3  ;;  %vm59_vm0 = vcmp.eq.s32.totalorder %v58_v7, 1 }
  0x13   :  { %v63_v8 = vsub.f32 %v46_v0, %v62_v5 }
  0x14   :  { %vm60_vm1 = vcmp.lt.s32.totalorder %v57_v6, 16  ;;  %v70_v18 = vld [vmem:[#allocation2] sm:$0x1] }
  0x15   :  { %v66_v9 = vmul.f32 %v63_v8, %v63_v8  ;;  %vm226_vm2 = vmand %vm59_vm0, %vm60_vm1  ;;  %v79_v33 = vld [vmem:[#allocation3] sm:$0x1] }
  0x17   :  { %v67_v11 = vsel %vm226_vm2, %v66_v9, 0.0 }
  0x18   :  { %v71_v12 = vrot.slane %v67_v11, 4 }
  0x1a   :  { %v72_v14 = vadd.f32 %v71_v12, %v67_v11 }
  0x1c   :  { %v73_v15 = vrot.slane %v72_v14, 2 }
  0x1e   :  { %v74_v16 = vadd.f32 %v73_v15, %v72_v14 }
  0x20   :  { %v75_v17 = vrot.slane %v74_v16, 1 }
  0x22   :  { %v76_v19 = vadd.f32 %v75_v17, %v74_v16 }
  0x24   :  { %v77_v20 = vadd.f32 %v76_v19, %v70_v18 }
  0x26   :  { %78 = vst [vmem:[#allocation2] sm:$0x1] %v77_v20 }
  0x2d   :  { %v92_v21 = vld [vmem:[#allocation2] sm:$0x1] }
  0x2e   :  { %v94_v22 = vsel %vm93_vm3, %v92_v21, 0.0 }
  0x37   :  { %95 = vadd.xlane.f32.xlu0 %v94_v22 }
  0x7f   :  { %v48_v24 = vpop.permute.xlu0 %47 }
  0x80   :  { %v65_v25 = vsub.f32 %v64_v23, %v48_v24 }
  0x82   :  { %v68_v26 = vmul.f32 %v65_v25, %v65_v25 }
  0x84   :  { %v69_v27 = vsel %vm226_vm2, %v68_v26, 0.0 }
  0x85   :  { %v80_v28 = vrot.slane %v69_v27, 4 }
  0x87   :  { %v81_v29 = vadd.f32 %v80_v28, %v69_v27 }
  0x89   :  { %v82_v30 = vrot.slane %v81_v29, 2 }
  0x8b   :  { %v83_v31 = vadd.f32 %v82_v30, %v81_v29 }
  0x8d   :  { %v84_v32 = vrot.slane %v83_v31, 1 }
  0x8f   :  { %v85_v34 = vadd.f32 %v84_v32, %v83_v31 }
  0x91   :  { %v86_v35 = vadd.f32 %v85_v34, %v79_v33 }
  0x93   :  { %87 = vst [vmem:[#allocation3] sm:$0x1] %v86_v35 }
  0x9a   :  { %v104_v36 = vld [vmem:[#allocation3] sm:$0x1] }
  0x9b   :  { %v105_v37 = vsel %vm93_vm3, %v104_v36, 0.0 }
  0x9c   :  { %106 = vadd.xlane.f32.xlu1 %v105_v37 }
  0xaa   :  { %v96_v38 = vpop.xlane.xlu0 %95 }
  0xab   :  { %v97_v39 = vrot.slane %v96_v38, 4 }
  0xad   :  { %v98_v40 = vadd.f32 %v97_v39, %v96_v38 }
  0xaf   :  { %v99_v41 = vrot.slane %v98_v40, 2 }
  0xb1   :  { %v100_v42 = vadd.f32 %v99_v41, %v98_v40 }
  0xb3   :  { %v101_v43 = vrot.slane %v100_v42, 1 }
  0xb5   :  { %v102_v44 = vadd.f32 %v101_v43, %v100_v42 }
  0xb7   :  { %137 = vpush %v102_v44 }
  0xe8   :  { %s138_s19 = spop %137 }
 0x10f   :  { %v107_v45 = vpop.xlane.xlu1 %106 }
 0x110   :  { %v108_v46 = vrot.slane %v107_v45, 4 }
 0x112   :  { %v109_v47 = vadd.f32 %v108_v46, %v107_v45 }
 0x114   :  { %v110_v48 = vrot.slane %v109_v47, 2 }
 0x116   :  { %v111_v49 = vadd.f32 %v110_v48, %v109_v47 }
 0x118   :  { %v112_v50 = vrot.slane %v111_v49, 1 }
 0x11a   :  { %v113_v51 = vadd.f32 %v112_v50, %v111_v49 }
 0x11c   :  { %139 = vpush %v113_v51 }
 0x14d   :  { %s140_s23 = spop %139 }
 0x14e   :  { %s115_s24 = smul.f32 %s140_s23, %s136_s1 }
 0x150   :  { %s116_s25 = sadd.f32 %s138_s19, %s115_s24 }
 0x152   :  { %118 = sst [smem:[#allocation9]] %s116_s25 }
 0x153   :  { %127 = dma.smem_to_hbm %s204_s26, 16, %s125_s22, [#allocation7]  }
 0x154   :  { %198 = dma.done.wait [#allocation7], 16  }
 0x155   :  { %199 = vsyncadd [#allocation7], 4294967280 }
 0x156   :  { %132 = sfence }
 0x157   :  { %133 = vsyncpa [#allocation5], 1 }
 0x158   :  { %134 = vsyncpa [#allocation6], 1 }
 0x159   :  { %135 = vsyncpa [#allocation7], 1 }

</bundles_post_ra>
